<compile_context>
chip_gen: v7x
topology: tpu7x:2x2x1
jax: 0.10.0
libtpu: 0.0.40
codegen_flags: <defaults>
</compile_context>

<pallas_src>
import jax
import jax.numpy as jnp
from jax.experimental import pallas as pl
from jax.experimental.pallas import tpu as pltpu


def actor_kernel(x_ref, w1_ref, b1_ref, w2_ref, b2_ref, w3_ref, b3_ref, o_ref):
    mxu = w1_ref.dtype  # MXU input dtype (f32 or bf16); accumulation is always f32

    # Layer 1: Linear + ReLU  (MXU matmul, f32 accumulate, f32 bias/activation)
    x = x_ref[...].astype(mxu)
    h1 = jnp.dot(x, w1_ref[...], preferred_element_type=jnp.float32) + b1_ref[...]
    h1 = jnp.maximum(h1, 0.0)

    # Layer 2: Linear + ReLU
    h2 = jnp.dot(h1.astype(mxu), w2_ref[...], preferred_element_type=jnp.float32) + b2_ref[...]
    h2 = jnp.maximum(h2, 0.0)

    # Layer 3: Linear + softmax over dim=1 (lane axis), natural O columns.
    logits = jnp.dot(h2.astype(mxu), w3_ref[...], preferred_element_type=jnp.float32) + b3_ref[...]
    m = jnp.max(logits, axis=1, keepdims=True)
    e = jnp.exp(logits - m)
    denom = jnp.sum(e, axis=1, keepdims=True)
    inv = pl.reciprocal(denom, approx=True)        # EUP vrcp (free slot)
    inv = inv * (2.0 - denom * inv)                # one Newton step -> near-f32 accuracy
    o_ref[...] = (e * inv).astype(o_ref.dtype)


def _round_up(n, m):
    return ((n + m - 1) // m) * m


def actor_forward(x, params, *, block_b=8192, mxu_dtype=jnp.bfloat16):
    """Forward pass of the Actor policy head.

    x: (batch, input_dim), any float dtype (pass bf16 to halve the HBM read stream).
    params: (w1, b1, w2, b2, w3, b3) with w_i stored pre-transposed as (in, out)
            and b_i as (1, out).
    block_b: max batch-tile size (rows per grid step).
    mxu_dtype: dtype fed to the MXU (jnp.bfloat16 or jnp.float32); accumulation is f32.
    """
    w1, b1, w2, b2, w3, b3 = params
    B, Din = x.shape
    H = w1.shape[1]
    O = w3.shape[1]

    # Weights in the MXU dtype (tiny, resident across grid steps); biases stay f32.
    w1c, w2c, w3c = (w.astype(mxu_dtype) for w in (w1, w2, w3))
    b1c, b2c, b3c = (b.astype(jnp.float32) for b in (b1, b2, b3))

    # Batch tile: 8-aligned, at most block_b rows, but capped near cdiv(B, 4) so that
    # there are >=4 grid steps whenever B allows (megacore split + pipeline depth).
    tb_cap_for_steps = max(8, _round_up(pl.cdiv(B, 4), 8))
    TB = max(8, min(_round_up(block_b, 8), tb_cap_for_steps, _round_up(B, 8)))
    grid = (pl.cdiv(B, TB),)   # ragged last block: padded reads, masked writes

    out = pl.pallas_call(
        actor_kernel,
        out_shape=jax.ShapeDtypeStruct((B, O), jnp.float32),
        grid=grid,
        in_specs=[
            pl.BlockSpec((TB, Din), lambda i: (i, 0)),    # x: tiled over batch
            pl.BlockSpec((Din, H), lambda i: (0, 0)),     # w1: resident
            pl.BlockSpec((1, H), lambda i: (0, 0)),       # b1: resident
            pl.BlockSpec((H, H), lambda i: (0, 0)),       # w2: resident
            pl.BlockSpec((1, H), lambda i: (0, 0)),       # b2: resident
            pl.BlockSpec((H, O), lambda i: (0, 0)),       # w3: resident
            pl.BlockSpec((1, O), lambda i: (0, 0)),       # b3: resident
        ],
        out_specs=pl.BlockSpec((TB, O), lambda i: (i, 0)),
        compiler_params=pltpu.CompilerParams(
            # Batch tiles are independent -> shard across both TCs on v7x.
            dimension_semantics=("parallel",),
        ),
    )(x, w1c, b1c, w2c, b2c, w3c, b3c)

    return out


def init_actor_params(key, input_dim, n_hidden, output_dim):
    """Deterministic init mimicking nn.Linear's uniform(-1/sqrt(fan_in), 1/sqrt(fan_in)).

    Weights are returned already transposed to (in_features, out_features)."""
    def linear(k, fan_in, fan_out):
        kw, kb = jax.random.split(k)
        bound = 1.0 / jnp.sqrt(jnp.float32(fan_in))
        w = jax.random.uniform(kw, (fan_in, fan_out), jnp.float32, -bound, bound)
        b = jax.random.uniform(kb, (1, fan_out), jnp.float32, -bound, bound)
        return w, b

    k1, k2, k3 = jax.random.split(key, 3)
    w1, b1 = linear(k1, input_dim, n_hidden)
    w2, b2 = linear(k2, n_hidden, n_hidden)
    w3, b3 = linear(k3, n_hidden, output_dim)
    return (w1, b1, w2, b2, w3, b3)


if __name__ == "__main__":
    key = jax.random.PRNGKey(0)
    k_x, k_p, k_big = jax.random.split(key, 3)

    batch, input_dim, n_hidden, output_dim = 8, 16, 32, 8
    x = jax.random.normal(k_x, (batch, input_dim), jnp.float32)
    params = init_actor_params(k_p, input_dim, n_hidden, output_dim)
    w1, b1, w2, b2, w3, b3 = params

    def ref_fwd(xx, dt):
        h1 = jnp.maximum(
            jnp.dot(xx.astype(dt), w1.astype(dt), preferred_element_type=jnp.float32) + b1, 0.0)
        h2 = jnp.maximum(
            jnp.dot(h1.astype(dt), w2.astype(dt), preferred_element_type=jnp.float32) + b2, 0.0)
        logits = jnp.dot(h2.astype(dt), w3.astype(dt), preferred_element_type=jnp.float32) + b3
        return jax.nn.softmax(logits, axis=1)

    # --- Small-batch correctness check (f32 MXU path, single grid step). ---
    out = jax.block_until_ready(actor_forward(x, params, mxu_dtype=jnp.float32))
    ref = ref_fwd(x, jnp.float32)
    assert out.shape == (batch, output_dim)
    assert jnp.allclose(out, ref, atol=1e-4), "f32 mismatch vs reference"
    assert jnp.allclose(jnp.sum(out, axis=1), 1.0, atol=1e-3)

    # --- Larger batch exercising the batch grid + ragged last block (B=300, TB=80). ---
    big_b = 300
    xb = jax.random.normal(k_big, (big_b, input_dim), jnp.float32)
    outb = jax.block_until_ready(actor_forward(xb, params, block_b=128, mxu_dtype=jnp.float32))
    refb = ref_fwd(xb, jnp.float32)
    assert outb.shape == (big_b, output_dim)
    assert jnp.allclose(outb, refb, atol=1e-4), "grid path mismatch vs reference"
    assert jnp.allclose(jnp.sum(outb, axis=1), 1.0, atol=1e-3)

    # --- Default bf16 MXU-input path (v6e/v7x fast path), f32 accumulate/elementwise. ---
    outbf = jax.block_until_ready(actor_forward(xb, params))
    refbf = ref_fwd(xb, jnp.bfloat16)
    assert outbf.shape == (big_b, output_dim)
    assert jnp.allclose(outbf, refbf, atol=2e-2), "bf16 mismatch vs bf16 reference"
    assert jnp.allclose(jnp.sum(outbf, axis=1), 1.0, atol=1e-2)

    # --- x already stored as bf16: no wrapper cast, bf16 HBM read stream. ---
    outb16 = jax.block_until_ready(actor_forward(xb.astype(jnp.bfloat16), params))
    assert jnp.allclose(outb16, refbf, atol=2e-2), "bf16-input mismatch vs bf16 reference"

    print("KERNEL_OK")
</pallas_src>

<mosaic_0001>
module attributes {stable_mosaic.version = 11 : i64} {
  func.func @actor_kernel(%arg0: i32, %arg1: memref<8x16xf32, #tpu.memory_space<vmem>>, %arg2: memref<16x32xf32, #tpu.memory_space<vmem>>, %arg3: memref<1x32xf32, #tpu.memory_space<vmem>>, %arg4: memref<32x32xf32, #tpu.memory_space<vmem>>, %arg5: memref<1x32xf32, #tpu.memory_space<vmem>>, %arg6: memref<32x8xf32, #tpu.memory_space<vmem>>, %arg7: memref<1x8xf32, #tpu.memory_space<vmem>>, %arg8: memref<8x8xf32, #tpu.memory_space<vmem>>) attributes {dimension_semantics = [#tpu.dimension_semantics<parallel>], iteration_bounds = array<i64: 1>, scalar_prefetch = 0 : i64, scratch_operands = 0 : i64, tpu.core_type = #tpu.core_type<tc>, window_params = [{transform_indices = @transform_0, window_bounds = array<i64: 8, 16>}, {pipeline_mode = #tpu.pipeline_mode<synchronous>, transform_indices = @transform_1, window_bounds = array<i64: 16, 32>}, {pipeline_mode = #tpu.pipeline_mode<synchronous>, transform_indices = @transform_2, window_bounds = array<i64: 1, 32>}, {pipeline_mode = #tpu.pipeline_mode<synchronous>, transform_indices = @transform_3, window_bounds = array<i64: 32, 32>}, {pipeline_mode = #tpu.pipeline_mode<synchronous>, transform_indices = @transform_4, window_bounds = array<i64: 1, 32>}, {pipeline_mode = #tpu.pipeline_mode<synchronous>, transform_indices = @transform_5, window_bounds = array<i64: 32, 8>}, {pipeline_mode = #tpu.pipeline_mode<synchronous>, transform_indices = @transform_6, window_bounds = array<i64: 1, 8>}, {transform_indices = @transform_7, window_bounds = array<i64: 8, 8>}]} {
    %c0 = arith.constant 0 : index
    %c0_0 = arith.constant 0 : index
    %0 = vector.load %arg1[%c0, %c0_0] : memref<8x16xf32, #tpu.memory_space<vmem>>, vector<8x16xf32>
    %c0_1 = arith.constant 0 : index
    %c0_2 = arith.constant 0 : index
    %1 = vector.load %arg2[%c0_1, %c0_2] : memref<16x32xf32, #tpu.memory_space<vmem>>, vector<16x32xf32>
    %cst = arith.constant dense<0.000000e+00> : vector<8x32xf32>
    %2 = tpu.matmul %0, %1, %cst {dimension_numbers = #tpu.dot_dimension_numbers<[1], [0], [0], [1], [0, 0, 1, 1], [], []>} : vector<8x16xf32>, vector<16x32xf32>, vector<8x32xf32> -> vector<8x32xf32>
    %c0_3 = arith.constant 0 : index
    %c0_4 = arith.constant 0 : index
    %3 = vector.load %arg3[%c0_3, %c0_4] : memref<1x32xf32, #tpu.memory_space<vmem>>, vector<1x32xf32>
    %4 = vector.broadcast %3 : vector<1x32xf32> to vector<8x32xf32>
    %5 = arith.addf %2, %4 : vector<8x32xf32>
    %cst_5 = arith.constant 0.000000e+00 : f32
    %6 = vector.broadcast %cst_5 : f32 to vector<8x32xf32>
    %7 = arith.maximumf %5, %6 : vector<8x32xf32>
    %c0_6 = arith.constant 0 : index
    %c0_7 = arith.constant 0 : index
    %8 = vector.load %arg4[%c0_6, %c0_7] : memref<32x32xf32, #tpu.memory_space<vmem>>, vector<32x32xf32>
    %cst_8 = arith.constant dense<0.000000e+00> : vector<8x32xf32>
    %9 = tpu.matmul %7, %8, %cst_8 {dimension_numbers = #tpu.dot_dimension_numbers<[1], [0], [0], [1], [0, 0, 1, 1], [], []>} : vector<8x32xf32>, vector<32x32xf32>, vector<8x32xf32> -> vector<8x32xf32>
    %c0_9 = arith.constant 0 : index
    %c0_10 = arith.constant 0 : index
    %10 = vector.load %arg5[%c0_9, %c0_10] : memref<1x32xf32, #tpu.memory_space<vmem>>, vector<1x32xf32>
    %11 = vector.broadcast %10 : vector<1x32xf32> to vector<8x32xf32>
    %12 = arith.addf %9, %11 : vector<8x32xf32>
    %cst_11 = arith.constant 0.000000e+00 : f32
    %13 = vector.broadcast %cst_11 : f32 to vector<8x32xf32>
    %14 = arith.maximumf %12, %13 : vector<8x32xf32>
    %c0_12 = arith.constant 0 : index
    %c0_13 = arith.constant 0 : index
    %15 = vector.load %arg6[%c0_12, %c0_13] : memref<32x8xf32, #tpu.memory_space<vmem>>, vector<32x8xf32>
    %cst_14 = arith.constant dense<0.000000e+00> : vector<8x8xf32>
    %16 = tpu.matmul %14, %15, %cst_14 {dimension_numbers = #tpu.dot_dimension_numbers<[1], [0], [0], [1], [0, 0, 1, 1], [], []>} : vector<8x32xf32>, vector<32x8xf32>, vector<8x8xf32> -> vector<8x8xf32>
    %c0_15 = arith.constant 0 : index
    %c0_16 = arith.constant 0 : index
    %17 = vector.load %arg7[%c0_15, %c0_16] : memref<1x8xf32, #tpu.memory_space<vmem>>, vector<1x8xf32>
    %18 = vector.broadcast %17 : vector<1x8xf32> to vector<8x8xf32>
    %19 = arith.addf %16, %18 : vector<8x8xf32>
    %cst_17 = arith.constant dense<0xFF800000> : vector<8xf32>
    %20 = vector.multi_reduction <maximumf>, %19, %cst_17 [1] : vector<8x8xf32> to vector<8xf32>
    %21 = vector.shape_cast %20 : vector<8xf32> to vector<8x1xf32>
    %22 = vector.broadcast %21 : vector<8x1xf32> to vector<8x8xf32>
    %23 = arith.subf %19, %22 : vector<8x8xf32>
    %24 = math.exp %23 : vector<8x8xf32>
    %cst_18 = arith.constant dense<0.000000e+00> : vector<8xf32>
    %25 = vector.multi_reduction <add>, %24, %cst_18 [1] : vector<8x8xf32> to vector<8xf32>
    %26 = vector.shape_cast %25 : vector<8xf32> to vector<8x1xf32>
    %27 = tpu.reciprocal %26 {approx = true} : vector<8x1xf32> -> vector<8x1xf32>
    %28 = arith.mulf %26, %27 : vector<8x1xf32>
    %cst_19 = arith.constant 2.000000e+00 : f32
    %29 = vector.broadcast %cst_19 : f32 to vector<8x1xf32>
    %30 = arith.subf %29, %28 : vector<8x1xf32>
    %31 = arith.mulf %27, %30 : vector<8x1xf32>
    %32 = vector.broadcast %31 : vector<8x1xf32> to vector<8x8xf32>
    %33 = arith.mulf %24, %32 : vector<8x8xf32>
    %c0_20 = arith.constant 0 : index
    %c0_21 = arith.constant 0 : index
    %34 = vector.load %arg8[%c0_20, %c0_21] : memref<8x8xf32, #tpu.memory_space<vmem>>, vector<8x8xf32>
    tpu.vector_store %arg8[%c0_20, %c0_21], %33 {strides = array<i32>} : memref<8x8xf32, #tpu.memory_space<vmem>>, vector<8x8xf32>,
    return
  }
  func.func @transform_0(%arg0: i32) -> (i32, i32) {
    %c0_i32 = arith.constant 0 : i32
    %c0_i32_0 = arith.constant 0 : i32
    return %arg0, %c0_i32 : i32, i32
  }
  func.func @transform_1(%arg0: i32) -> (i32, i32) {
    %c0_i32 = arith.constant 0 : i32
    %c0_i32_0 = arith.constant 0 : i32
    %c0_i32_1 = arith.constant 0 : i32
    return %c0_i32, %c0_i32_0 : i32, i32
  }
  func.func @transform_2(%arg0: i32) -> (i32, i32) {
    %c0_i32 = arith.constant 0 : i32
    %c0_i32_0 = arith.constant 0 : i32
    %c0_i32_1 = arith.constant 0 : i32
    return %c0_i32, %c0_i32_0 : i32, i32
  }
  func.func @transform_3(%arg0: i32) -> (i32, i32) {
    %c0_i32 = arith.constant 0 : i32
    %c0_i32_0 = arith.constant 0 : i32
    %c0_i32_1 = arith.constant 0 : i32
    return %c0_i32, %c0_i32_0 : i32, i32
  }
  func.func @transform_4(%arg0: i32) -> (i32, i32) {
    %c0_i32 = arith.constant 0 : i32
    %c0_i32_0 = arith.constant 0 : i32
    %c0_i32_1 = arith.constant 0 : i32
    return %c0_i32, %c0_i32_0 : i32, i32
  }
  func.func @transform_5(%arg0: i32) -> (i32, i32) {
    %c0_i32 = arith.constant 0 : i32
    %c0_i32_0 = arith.constant 0 : i32
    %c0_i32_1 = arith.constant 0 : i32
    return %c0_i32, %c0_i32_0 : i32, i32
  }
  func.func @transform_6(%arg0: i32) -> (i32, i32) {
    %c0_i32 = arith.constant 0 : i32
    %c0_i32_0 = arith.constant 0 : i32
    %c0_i32_1 = arith.constant 0 : i32
    return %c0_i32, %c0_i32_0 : i32, i32
  }
  func.func @transform_7(%arg0: i32) -> (i32, i32) {
    %c0_i32 = arith.constant 0 : i32
    %c0_i32_0 = arith.constant 0 : i32
    return %arg0, %c0_i32 : i32, i32
  }
}

</mosaic_0001>

<bundles_post_ra>
// kernel: tpu_custom_call.1
= control target key start
LH: loop header
LB: loop body
LE: loop exit
PB: predicated region body
PF: predicated region fallthrough
CT: control target
= control target key end

     0   :  { %12 = vsyncpa [#allocation3], 0  ;;  %s559_s0 = inlined_call_operand.hbm [shape: f32[8,16], index: 0, kind: input, shape index: {}]   ;;  %s560_s1 = inlined_call_operand.vmem [shape: f32[16,32], index: 1, kind: input, shape index: {}]   ;;  %s561_s2 = inlined_call_operand.vmem [shape: f32[1,32], index: 2, kind: input, shape index: {}]   ;;  %s562_s3 = inlined_call_operand.vmem [shape: f32[32,32], index: 3, kind: input, shape index: {}]   ;;  %s563_s4 = inlined_call_operand.vmem [shape: f32[1,32], index: 4, kind: input, shape index: {}]   ;;  %s564_s5 = inlined_call_operand.vmem [shape: f32[32,8], index: 5, kind: input, shape index: {}]   ;;  %s565_s6 = inlined_call_operand.vmem [shape: f32[1,8], index: 6, kind: input, shape index: {}]   ;;  %s566_s7 = inlined_call_operand.hbm [shape: f32[8,8], index: 7, kind: output, shape index: {}]  }
   0x1   :  { %13 = vsyncpa [#allocation4], 0  ;;  %s445_s24 = smov [#allocation2]   ;;  %s397_s28 = scalar_lea.hbm %s559_s0, 128 }
   0x2   :  { %s20_s25 = sshll.u32 %s445_s24, 4  ;;  %p398_p0 = scmp.ne.s32.totalorder %s559_s0, %s397_s28  ;;  %s21_s25 = int_to_ptr.vmem [resolvable:$true] %s20_s25 }
   0x3   :  { %p401_p1 = scmp.lt.u32.totalorder %s397_s28, %s559_s0 }
   0x5   :  { %p403_p2 = pnand %p401_p1, %p398_p0 }
   0x7   :  { %406 = shalt.err (!%p403_p2)
}
   0x8   :  { %s407_s10 = scalar_lea.vmem %s21_s25, 128  ;;  %p412_p4 = scmp.lt.s32.totalorder %s21_s25, %s21_s25 }
   0x9   :  { %p408_p3 = scmp.ne.s32.totalorder %s21_s25, %s407_s10  ;;  %p413_p5 = scmp.lt.s32.totalorder %s407_s10, %s407_s10 }
   0xb   :  { %p414_p6 = por %p413_p5, %p412_p4 }
   0xd   :  { %p415_p7 = pnand %p414_p6, %p408_p3 }
   0xf   :  { %418 = shalt.err (!%p415_p7)
}
  0x10   :  { %23 = dma.hbm_to_vmem [thread:$0]  %s559_s0, 128, %s21_s25, [#allocation3]  }
  0x11   :  { %441 = dma.done.wait [#allocation3], 128  }
  0x12   :  { %442 = vsyncadd [#allocation3], 4294967168  ;;  %v446_v0 = vmov 0.0|0.0   ;;  %vm447_vm0 = vmmov 0   ;;  %v448_v1 = vmov 0.0   ;;  %v40_v2 = vld [vmem:[%s560_s1] sm:$0xff] }
  0x13   :  { %373 = vmatprep.subr.bf16.mxu0 %v446_v0  ;;  %348 = vmatprep.mubr.msk.f32.mxu0 %vm447_vm0, %v448_v1  ;;  %v41_v3 = vld [vmem:[%s560_s1 + $0x8] sm:$0xff]  ;;  %v124_v5 = vld [vmem:[%s562_s3] sm:$0xff]  ;;  %vm49_vm1 = vcmask 130048   ;;  %v126_v9 = vld [vmem:[%s562_s3 + $0x10] sm:$0xff]  ;;  %vm135_vm2 = vcmask 261120   ;;  %vm294_vm3 = vcmask 64512  }
  0x14   :  { %376 = vmatprep.subr.bf16.mxu1 %v446_v0  ;;  %359 = vmatprep.mubr.msk.f32.mxu1 %vm447_vm0, %v448_v1  ;;  %v374_v4 = vpack.c.bf16 %v41_v3, %v40_v2  ;;  %v125_v6 = vld [vmem:[%s562_s3 + $0x8] sm:$0xff]  ;;  %v39_v8 = vld [vmem:[#allocation2] sm:$0xff]  ;;  %v127_v10 = vld [vmem:[%s562_s3 + $0x18] sm:$0xff] }
  0x15   :  { %v377_v7 = vpack.c.bf16 %v125_v6, %v124_v5  ;;  %v380_v11 = vpack.c.bf16 %v127_v10, %v126_v9  ;;  %v210_v12 = vld [vmem:[%s564_s5] sm:$0xff]  ;;  %v211_v13 = vld [vmem:[%s564_s5 + $0x8] sm:$0xff]  ;;  %v212_v20 = vld [vmem:[%s564_s5 + $0x10] sm:$0xff] }
  0x16   :  { %375 = vmatpush3.bf16.msra.mxu0 %v374_v4  ;;  %v383_v14 = vpack.c.bf16 %v211_v13, %v210_v12  ;;  %v325_v15 = vld [vmem:[%s561_s2] ss:$0 sm:$0xff]  ;;  %v213_v21 = vld [vmem:[%s564_s5 + $0x18] sm:$0xff] }
  0x17   :  { %378 = vmatpush3.bf16.msra.mxu1 %v377_v7  ;;  %382 = vmatprep.subr.bf16.mxu0 %v446_v0  ;;  %v386_v22 = vpack.c.bf16 %v213_v21, %v212_v20  ;;  %v327_v23 = vld [vmem:[%s563_s4] ss:$0 sm:$0xff]  ;;  %s449_s4 = smov [#allocation5]  }
  0x18   :  { %379 = vmatprep.subr.bf16.mxu1 %v446_v0  ;;  %v329_v28 = vld [vmem:[%s565_s6] ss:$0 sm:$0xff]  ;;  %s316_s5 = sshll.u32 %s449_s4, 4  ;;  %s317_s5 = int_to_ptr.vmem [resolvable:$true] %s316_s5 }
  0x19   :  { %349 = vmatmul.mubr.msk.f32.vlgmr.msra.gmra.mrb[0].mxu0 %vm49_vm1, %v39_v8  ;;  %s419_s6 = scalar_lea.vmem %s317_s5, 128  ;;  %p424_p9 = scmp.lt.s32.totalorder %s317_s5, %s317_s5 }
  0x1a   :  { %370 = vmatprep.mubr.msk.f32.mxu0 %vm447_vm0, %v448_v1  ;;  %384 = vmatpush3.bf16.msra.mxu0 %v383_v14  ;;  %p420_p8 = scmp.ne.s32.totalorder %s317_s5, %s419_s6  ;;  %p425_p10 = scmp.lt.s32.totalorder %s419_s6, %s419_s6 }
  0x1b   :  { %381 = vmatpush3.bf16.msra.mxu1 %v380_v11  ;;  %385 = vmatprep.subr.bf16.mxu0 %v446_v0 }
  0x1c   :  { %p426_p11 = por %p425_p10, %p424_p9 }
  0x1e   :  { %387 = vmatpush3.bf16.msra.mxu0 %v386_v22  ;;  %p427_p12 = pnand %p426_p11, %p420_p8 }
  0xec   :  { %v119_v16 = vpop.f32.mrb[0].mxu0 }
  0xed   :  { %v120_v17 = vadd.f32 %v325_v15, %v119_v16  ;;  %v350_v18 = vpop.f32.mrb[1].mxu0 }
  0xef   :  { %v123_v19 = vmax.f32 %v120_v17, 0.0 }
  0xf1   :  { %360 = vmatmul.mubr.msk.f32.vlgmr.msra.gmra.mrb[0].mxu1 %vm135_vm2, %v123_v19 }
 0x1c4   :  { %v205_v24 = vpop.f32.mrb[0].mxu1 }
 0x1c5   :  { %v206_v25 = vadd.f32 %v327_v23, %v205_v24  ;;  %v361_v26 = vpop.f32.mrb[1].mxu1 }
 0x1c7   :  { %v209_v27 = vmax.f32 %v206_v25, 0.0 }
 0x1c9   :  { %371 = vmatmul.mubr.msk.f32.vlgmr.msra.gmra.mrb[2].mxu0 %vm135_vm2, %v209_v27 }
 0x29c   :  { %v290_v29 = vpop.f32.mrb[2].mxu0 }
 0x29d   :  { %v291_v30 = vadd.f32 %v329_v28, %v290_v29  ;;  %v372_v31 = vpop.f32.mrb[3].mxu0 }
 0x29f   :  { %v295_v32 = vsel %vm294_vm3, %v291_v30, -inf }
 0x2a0   :  { %296 = vmax.xlane.f32.xlu0 %v295_v32 }
 0x32d   :  { %v297_v33 = vpop.xlane.xlu0 %296 }
 0x32e   :  { %v298_v34 = vsub.f32 %v291_v30, %v297_v33 }
 0x330   :  { %v299_v35 = vmul.f32 1.442695, %v298_v34 }
 0x332   :  { %393 = vpow2.f32 %v299_v35 }
 0x33c   :  { %v394_v36 = vpop.eup %393 }
 0x33d   :  { %v301_v37 = vsel %vm294_vm3, %v394_v36, 0.0 }
 0x33e   :  { %302 = vadd.xlane.f32.xlu0 %v301_v37 }
 0x3cb   :  { %v303_v38 = vpop.xlane.xlu0 %302 }
 0x3cc   :  { %395 = vrcp.f32 %v303_v38 }
 0x3d6   :  { %v396_v39 = vpop.eup %395 }
 0x3d7   :  { %v305_v40 = vmul.f32 %v396_v39, %v303_v38 }
 0x3d9   :  { %v306_v41 = vsub.f32 2.0, %v305_v40 }
 0x3db   :  { %v307_v42 = vmul.f32 %v396_v39, %v306_v41 }
 0x3dd   :  { %v308_v43 = vmul.f32 %v394_v36, %v307_v42 }
 0x3df   :  { %309 = vst.msk [vmem:[#allocation5] sm:$0xff] %vm294_vm3, %v308_v43 }
 0x3e0   :  { %430 = shalt.err (!%p427_p12)
}
 0x3e1   :  { %s431_s14 = scalar_lea.hbm %s566_s7, 128 }
 0x3e2   :  { %p432_p13 = scmp.ne.s32.totalorder %s566_s7, %s431_s14  ;;  %p435_p0 = scmp.lt.u32.totalorder %s431_s14, %s566_s7 }
 0x3e4   :  { %p437_p1 = pnand %p435_p0, %p432_p13 }
 0x3e6   :  { %440 = shalt.err (!%p437_p1)
}
 0x3e7   :  { %319 = dma.vmem_to_hbm [thread:$0]  %s317_s5, 128, %s566_s7, [#allocation4]  }
 0x3e8   :  { %443 = dma.done.wait [#allocation4], 128  }
 0x3e9   :  { %444 = vsyncadd [#allocation4], 4294967168 }
 0x3ea   :  { %323 = vsyncpa [#allocation3], 1 }
 0x3eb   :  { %324 = vsyncpa [#allocation4], 1 }

</bundles_post_ra>
